<compile_context>
chip_gen: v7x
topology: tpu7x:2x2x1
jax: 0.10.0
libtpu: 0.0.40
codegen_flags: <defaults>
</compile_context>

<pallas_src>
import functools
from typing import NamedTuple

import jax
import jax.numpy as jnp
from jax import lax
from jax.experimental import pallas as pl
from jax.experimental.pallas import tpu as pltpu

EPS = 1e-07
INF = 100000.0
BIG = 1e15  # sentinel cost for priors outside every gt box / center region


class MatchResult(NamedTuple):
    assigned_gt_indices: jax.Array
    assigned_labels: jax.Array
    assigned_gt_iou: jax.Array


def _round_up(x, m):
    return ((x + m - 1) // m) * m


def _pad_last(x, target):
    pad = target - x.shape[-1]
    if pad == 0:
        return x
    cfg = [(0, 0)] * (x.ndim - 1) + [(0, pad)]
    return jnp.pad(x, cfg)


def _pad_first(x, target):
    pad = target - x.shape[0]
    if pad == 0:
        return x
    cfg = [(0, pad)] + [(0, 0)] * (x.ndim - 1)
    return jnp.pad(x, cfg)


# ---------------------------------------------------------------------------
# Kernel A: per-prior validity, pairwise IoU and SimOTA cost matrix, computed
# directly in the lane-dense (num_gt_pad, tile_p) orientation.
# ---------------------------------------------------------------------------
def _cost_kernel(priors_t_ref, boxes_t_ref, scores_t_ref, gtb_ref, onehot_ref,
                 cost_ref, iou_ref, *, num_gt, num_priors,
                 center_radius, iou_weight, cls_weight):
    pr = priors_t_ref[...]                                   # (4, tp)
    tp = pr.shape[1]
    px, py = pr[0:1, :], pr[1:2, :]                          # (1, tp)
    psx, psy = pr[2:3, :], pr[3:4, :]

    gtb = gtb_ref[...]                                       # (Gp, 4)
    gx1, gy1 = gtb[:, 0:1], gtb[:, 1:2]                      # (Gp, 1)
    gx2, gy2 = gtb[:, 2:3], gtb[:, 3:4]

    # masks for padded gt rows (sublane) and padded prior lanes
    gt_real = lax.broadcasted_iota(jnp.int32, (gtb.shape[0], 1), 0) < num_gt
    lane = lax.broadcasted_iota(jnp.int32, (1, tp), 1)
    prior_real = (pl.program_id(0) * tp + lane) < num_priors  # (1, tp)

    # ---- prior-center inside gt box ----------------------------------------
    l_ = px - gx1
    t_ = py - gy1
    r_ = gx2 - px
    b_ = gy2 - py
    is_in_gts = jnp.minimum(jnp.minimum(l_, t_), jnp.minimum(r_, b_)) > 0.0
    is_in_gts = jnp.logical_and(is_in_gts, gt_real)          # (Gp, tp)

    # ---- prior-center inside gt "center" box -------------------------------
    gcx = (gx1 + gx2) * 0.5
    gcy = (gy1 + gy2) * 0.5
    cl_ = px - (gcx - center_radius * psx)
    ct_ = py - (gcy - center_radius * psy)
    cr_ = (gcx + center_radius * psx) - px
    cb_ = (gcy + center_radius * psy) - py
    is_in_cts = jnp.minimum(jnp.minimum(cl_, ct_), jnp.minimum(cr_, cb_)) > 0.0
    is_in_cts = jnp.logical_and(is_in_cts, gt_real)

    in_any = jnp.logical_or(is_in_gts, is_in_cts)
    valid = jnp.max(in_any.astype(jnp.float32), axis=0, keepdims=True) > 0.0
    in_box_and_center = jnp.logical_and(is_in_gts, is_in_cts)

    # ---- pairwise IoU (decoded boxes vs gt boxes) --------------------------
    bx = boxes_t_ref[...]                                    # (4, tp)
    bx1, by1 = bx[0:1, :], bx[1:2, :]
    bx2, by2 = bx[2:3, :], bx[3:4, :]
    area_p = (bx2 - bx1) * (by2 - by1)                       # (1, tp)
    area_g = (gx2 - gx1) * (gy2 - gy1)                       # (Gp, 1)
    iw = jnp.maximum(jnp.minimum(bx2, gx2) - jnp.maximum(bx1, gx1), 0.0)
    ih = jnp.maximum(jnp.minimum(by2, gy2) - jnp.maximum(by1, gy1), 0.0)
    inter = iw * ih
    union = jnp.maximum(area_p + area_g - inter, EPS)        # eps guard (0/0)
    iou = inter / union                                      # (Gp, tp)

    # ---- classification BCE cost, summed over classes ----------------------
    # sum_c BCE = -(log p[label] + sum_{c!=label} log(1-p_c))
    #           = -(sum_c log(1-p_c) + (log p - log(1-p))[label])
    # The gather over the label index is one tiny MXU matmul (Gp x C) x (C, tp).
    p = scores_t_ref[...].astype(jnp.float32)                # (C, tp)
    log_p = jnp.maximum(jnp.log(p), -100.0)                  # torch BCE clamp
    log_1mp = jnp.maximum(jnp.log(1.0 - p), -100.0)
    sum_log_1mp = jnp.sum(log_1mp, axis=0, keepdims=True)    # (1, tp)
    gathered = jnp.dot(onehot_ref[...], log_p - log_1mp,
                       preferred_element_type=jnp.float32)   # (Gp, tp)
    cls_cost = -(sum_log_1mp + gathered)

    iou_cost = -jnp.log(iou + EPS)
    cost = (cls_cost * cls_weight + iou_cost * iou_weight
            + (1.0 - in_box_and_center.astype(jnp.float32)) * INF)

    keep = jnp.logical_and(jnp.logical_and(valid, prior_real), gt_real)
    cost_ref[...] = jnp.where(keep, cost, BIG)
    iou_ref[...] = jnp.where(keep, iou, 0.0)


# ---------------------------------------------------------------------------
# Kernel B: dynamic-k matching on the (num_gt_pad, num_priors_pad) matrices.
# Heavy reductions (top-k IoU, iterative lowest-cost selection) run along the
# lane (last) axis; no O(P^2) intermediates.
# ---------------------------------------------------------------------------
def _matching_kernel(cost_ref, iou_ref, gtind_ref, label_ref, giou_ref, *,
                     candidate_topk, num_gt):
    cost = cost_ref[...]                                     # (Gp, P)
    ious = iou_ref[...]                                      # (Gp, P)
    gpad, num_priors = cost.shape
    k = min(candidate_topk, num_priors)

    col_iota = lax.broadcasted_iota(jnp.int32, (gpad, num_priors), 1)
    row_iota = lax.broadcasted_iota(jnp.int32, (gpad, num_priors), 0)
    row_valid = lax.broadcasted_iota(jnp.int32, (gpad, 1), 0) < num_gt

    # dynamic_k[g] = clamp(int(sum of top-k IoUs of row g), 1); 0 for pad rows.
    def topk_body(_, carry):
        s, work = carry
        m = jnp.max(work, axis=1, keepdims=True)                        # (Gp,1)
        amax = jnp.min(jnp.where(work == m, col_iota, num_priors),
                       axis=1, keepdims=True)                           # (Gp,1)
        s = s + jnp.maximum(m, 0.0)
        work = jnp.where(col_iota == amax, -1.0, work)
        return s, work

    topk_sum, _ = lax.fori_loop(
        0, k, topk_body,
        (jnp.zeros((gpad, 1), jnp.float32), ious), unroll=True)
    dyn_ks = jnp.where(row_valid,
                       jnp.maximum(topk_sum.astype(jnp.int32), 1), 0)   # (Gp,1)

    # Iterative dyn_k-lowest-cost selection: exactly dyn_k priors per gt row,
    # first-index tie-break, O(G*P*k) with only (G,P) live state.
    def sel_body(t, carry):
        match, work = carry
        m = jnp.min(work, axis=1, keepdims=True)                        # (Gp,1)
        amin = jnp.min(jnp.where(work == m, col_iota, num_priors),
                       axis=1, keepdims=True)                           # (Gp,1)
        take = jnp.logical_and(col_iota == amin, t < dyn_ks)            # (Gp,P)
        match = jnp.where(take, 1.0, match)
        work = jnp.where(col_iota == amin, jnp.inf, work)
        return match, work

    match, _ = lax.fori_loop(
        0, k, sel_body, (jnp.zeros_like(cost), cost), unroll=True)

    # priors matched to several gts -> keep only the min-cost gt
    nmatch = jnp.sum(match, axis=0, keepdims=True)                      # (1,P)
    colmin = jnp.min(cost, axis=0, keepdims=True)                       # (1,P)
    argmin_g = jnp.min(jnp.where(cost == colmin, row_iota, gpad),
                       axis=0, keepdims=True)                           # (1,P)
    match = jnp.where(nmatch > 1.0,
                      (row_iota == argmin_g).astype(jnp.float32), match)

    fg = jnp.sum(match, axis=0, keepdims=True) > 0.0                    # (1,P)
    matched_gt = jnp.min(jnp.where(match > 0.0, row_iota, gpad),
                         axis=0, keepdims=True)                         # (1,P)
    matched_iou = jnp.sum(match * ious, axis=0, keepdims=True)          # (1,P)

    # torch early-return path (num_valid == 0 or num_gt == 0): every entry of
    # the dense cost matrix carries the BIG sentinel in that case.
    has_valid = jnp.min(colmin, axis=1, keepdims=True) < (0.5 * BIG)    # (1,1)
    fg = jnp.logical_and(fg, has_valid)

    gtind_ref[...] = jnp.where(fg, matched_gt, 0).astype(jnp.int32)
    label_ref[...] = jnp.where(fg, 1, -1).astype(jnp.int32)
    giou_ref[...] = jnp.where(fg, matched_iou,
                              jnp.where(has_valid, -INF, 0.0))


# ---------------------------------------------------------------------------
# Wrapper (glue: transposed / padded inputs, two pallas_calls, final slicing)
# ---------------------------------------------------------------------------
def sim_ota_match(pred_scores, priors, decoded_bboxes, gt_bboxes, gt_labels,
                  *, center_radius=2.5, candidate_topk=10,
                  iou_weight=3.0, cls_weight=1.0, tile_p=512):
    num_priors, num_classes = pred_scores.shape
    num_gt = gt_bboxes.shape[0]

    tile_p = min(tile_p, _round_up(num_priors, 128))
    ppad = _round_up(num_priors, tile_p)
    gpad = max(8, _round_up(max(num_gt, 1), 8))

    # lane-dense transposed inputs (tiny HBM transposes; the big (G,P)
    # matrices are produced directly in their consumer layout).
    priors_t = _pad_last(priors.astype(jnp.float32).T, ppad)            # (4,Pp)
    boxes_t = _pad_last(decoded_bboxes.astype(jnp.float32).T, ppad)     # (4,Pp)
    scores_t = _pad_last(pred_scores.astype(jnp.float32).T, ppad)       # (C,Pp)
    gt_pad = _pad_first(gt_bboxes.astype(jnp.float32), gpad)            # (Gp,4)
    onehot = _pad_first(
        jax.nn.one_hot(gt_labels, num_classes, dtype=jnp.float32), gpad)

    cost, iou = pl.pallas_call(
        functools.partial(_cost_kernel, num_gt=num_gt, num_priors=num_priors,
                          center_radius=center_radius,
                          iou_weight=iou_weight, cls_weight=cls_weight),
        out_shape=(
            jax.ShapeDtypeStruct((gpad, ppad), jnp.float32),
            jax.ShapeDtypeStruct((gpad, ppad), jnp.float32),
        ),
        grid=(ppad // tile_p,),
        in_specs=[
            pl.BlockSpec((4, tile_p), lambda i: (0, i)),
            pl.BlockSpec((4, tile_p), lambda i: (0, i)),
            pl.BlockSpec((num_classes, tile_p), lambda i: (0, i)),
            pl.BlockSpec((gpad, 4), lambda i: (0, 0)),
            pl.BlockSpec((gpad, num_classes), lambda i: (0, 0)),
        ],
        out_specs=(
            pl.BlockSpec((gpad, tile_p), lambda i: (0, i)),
            pl.BlockSpec((gpad, tile_p), lambda i: (0, i)),
        ),
        compiler_params=pltpu.CompilerParams(
            dimension_semantics=("parallel",),
            vmem_limit_bytes=32 * 1024 * 1024),
    )(priors_t, boxes_t, scores_t, gt_pad, onehot)

    # TODO(synk): at very large num_priors * num_gt the single-block matching
    # kernel should be split over prior tiles (two-pass top-k) to shard across
    # v7x's two TensorCores; not needed at these sizes.
    vmem_b = int(min(48 * 1024 * 1024,
                     max(32 * 1024 * 1024, 16 * gpad * ppad * 4)))
    gtind, labels, giou = pl.pallas_call(
        functools.partial(_matching_kernel, candidate_topk=candidate_topk,
                          num_gt=num_gt),
        out_shape=(
            jax.ShapeDtypeStruct((1, ppad), jnp.int32),
            jax.ShapeDtypeStruct((1, ppad), jnp.int32),
            jax.ShapeDtypeStruct((1, ppad), jnp.float32),
        ),
        grid=(1,),
        in_specs=[
            pl.BlockSpec((gpad, ppad), lambda i: (0, 0)),
            pl.BlockSpec((gpad, ppad), lambda i: (0, 0)),
        ],
        out_specs=(
            pl.BlockSpec((1, ppad), lambda i: (0, 0)),
            pl.BlockSpec((1, ppad), lambda i: (0, 0)),
            pl.BlockSpec((1, ppad), lambda i: (0, 0)),
        ),
        compiler_params=pltpu.CompilerParams(
            dimension_semantics=("arbitrary",),
            vmem_limit_bytes=vmem_b),
    )(cost, iou)

    return MatchResult(gtind[0, :num_priors],
                       labels[0, :num_priors],
                       giou[0, :num_priors])


if __name__ == "__main__":
    key = jax.random.PRNGKey(0)
    num_priors, num_classes, num_gt = 256, 16, 8
    k1, k2, k3, k4, k5, k6 = jax.random.split(key, 6)

    # 16x16 anchor-free prior grid, stride 4 (image ~64x64)
    ys, xs = jnp.meshgrid(jnp.arange(16), jnp.arange(16), indexing="ij")
    cx = (xs.reshape(-1).astype(jnp.float32) + 0.5) * 4.0
    cy = (ys.reshape(-1).astype(jnp.float32) + 0.5) * 4.0
    stride = jnp.full((num_priors,), 4.0, jnp.float32)
    priors = jnp.stack([cx, cy, stride, stride], axis=1)

    # predicted (sigmoid) class scores in (0, 1)
    pred_scores = jax.nn.sigmoid(
        jax.random.normal(k1, (num_priors, num_classes), jnp.float32))

    # decoded predicted boxes around each prior (xyxy, positive width/height)
    wh = 4.0 + 8.0 * jax.random.uniform(k2, (num_priors, 2), jnp.float32)
    off = 2.0 * jax.random.normal(k3, (num_priors, 2), jnp.float32)
    ctr = jnp.stack([cx, cy], axis=1) + off
    decoded_bboxes = jnp.concatenate([ctr - wh / 2.0, ctr + wh / 2.0], axis=1)

    # ground-truth boxes / labels
    gt_ctr = 8.0 + 48.0 * jax.random.uniform(k4, (num_gt, 2), jnp.float32)
    gt_wh = 8.0 + 16.0 * jax.random.uniform(k5, (num_gt, 2), jnp.float32)
    gt_bboxes = jnp.concatenate([gt_ctr - gt_wh / 2.0, gt_ctr + gt_wh / 2.0],
                                axis=1)
    gt_labels = jax.random.randint(k6, (num_gt,), 0, num_classes, jnp.int32)

    result = sim_ota_match(pred_scores, priors, decoded_bboxes,
                           gt_bboxes, gt_labels)
    jax.tree_util.tree_map(jax.block_until_ready, result)

    assert result.assigned_gt_indices.shape == (num_priors,)
    assert result.assigned_labels.shape == (num_priors,)
    assert result.assigned_gt_iou.shape == (num_priors,)
    print("KERNEL_OK")
</pallas_src>

<mosaic_0001>
module attributes {stable_mosaic.version = 11 : i64} {
  func.func @_cost_kernel(%arg0: i32, %arg1: memref<4x256xf32, #tpu.memory_space<vmem>>, %arg2: memref<4x256xf32, #tpu.memory_space<vmem>>, %arg3: memref<16x256xf32, #tpu.memory_space<vmem>>, %arg4: memref<8x4xf32, #tpu.memory_space<vmem>>, %arg5: memref<8x16xf32, #tpu.memory_space<vmem>>, %arg6: memref<8x256xf32, #tpu.memory_space<vmem>>, %arg7: memref<8x256xf32, #tpu.memory_space<vmem>>) attributes {dimension_semantics = [#tpu.dimension_semantics<parallel>], iteration_bounds = array<i64: 1>, scalar_prefetch = 0 : i64, scratch_operands = 0 : i64, tpu.core_type = #tpu.core_type<tc>, window_params = [{transform_indices = @transform_0, window_bounds = array<i64: 4, 256>}, {transform_indices = @transform_1, window_bounds = array<i64: 4, 256>}, {transform_indices = @transform_2, window_bounds = array<i64: 16, 256>}, {pipeline_mode = #tpu.pipeline_mode<synchronous>, transform_indices = @transform_3, window_bounds = array<i64: 8, 4>}, {pipeline_mode = #tpu.pipeline_mode<synchronous>, transform_indices = @transform_4, window_bounds = array<i64: 8, 16>}, {transform_indices = @transform_5, window_bounds = array<i64: 8, 256>}, {transform_indices = @transform_6, window_bounds = array<i64: 8, 256>}]} {
    %c0 = arith.constant 0 : index
    %c0_0 = arith.constant 0 : index
    %0 = vector.load %arg1[%c0, %c0_0] : memref<4x256xf32, #tpu.memory_space<vmem>>, vector<4x256xf32>
    %1 = vector.extract_strided_slice %0 {offsets = [0, 0], sizes = [1, 256], strides = [1, 1]} : vector<4x256xf32> to vector<1x256xf32>
    %2 = vector.extract_strided_slice %0 {offsets = [1, 0], sizes = [1, 256], strides = [1, 1]} : vector<4x256xf32> to vector<1x256xf32>
    %3 = vector.extract_strided_slice %0 {offsets = [2, 0], sizes = [1, 256], strides = [1, 1]} : vector<4x256xf32> to vector<1x256xf32>
    %4 = vector.extract_strided_slice %0 {offsets = [3, 0], sizes = [1, 256], strides = [1, 1]} : vector<4x256xf32> to vector<1x256xf32>
    %c0_1 = arith.constant 0 : index
    %c0_2 = arith.constant 0 : index
    %5 = vector.load %arg4[%c0_1, %c0_2] : memref<8x4xf32, #tpu.memory_space<vmem>>, vector<8x4xf32>
    %6 = vector.extract_strided_slice %5 {offsets = [0, 0], sizes = [8, 1], strides = [1, 1]} : vector<8x4xf32> to vector<8x1xf32>
    %7 = vector.extract_strided_slice %5 {offsets = [0, 1], sizes = [8, 1], strides = [1, 1]} : vector<8x4xf32> to vector<8x1xf32>
    %8 = vector.extract_strided_slice %5 {offsets = [0, 2], sizes = [8, 1], strides = [1, 1]} : vector<8x4xf32> to vector<8x1xf32>
    %9 = vector.extract_strided_slice %5 {offsets = [0, 3], sizes = [8, 1], strides = [1, 1]} : vector<8x4xf32> to vector<8x1xf32>
    %10 = tpu.iota {dimensions = array<i32: 0>} : vector<8x1xi32>
    %c8_i32 = arith.constant 8 : i32
    %11 = vector.broadcast %c8_i32 : i32 to vector<8x1xi32>
    %12 = arith.cmpi slt, %10, %11 : vector<8x1xi32>
    %13 = tpu.iota {dimensions = array<i32: 1>} : vector<1x256xi32>
    %c256_i32 = arith.constant 256 : i32
    %14 = arith.muli %arg0, %c256_i32 : i32
    %15 = vector.broadcast %14 : i32 to vector<1x256xi32>
    %16 = arith.addi %15, %13 : vector<1x256xi32>
    %c256_i32_3 = arith.constant 256 : i32
    %17 = vector.broadcast %c256_i32_3 : i32 to vector<1x256xi32>
    %18 = arith.cmpi slt, %16, %17 : vector<1x256xi32>
    %19 = vector.broadcast %1 : vector<1x256xf32> to vector<8x256xf32>
    %20 = vector.broadcast %6 : vector<8x1xf32> to vector<8x256xf32>
    %21 = arith.subf %19, %20 : vector<8x256xf32>
    %22 = vector.broadcast %2 : vector<1x256xf32> to vector<8x256xf32>
    %23 = vector.broadcast %7 : vector<8x1xf32> to vector<8x256xf32>
    %24 = arith.subf %22, %23 : vector<8x256xf32>
    %25 = vector.broadcast %8 : vector<8x1xf32> to vector<8x256xf32>
    %26 = vector.broadcast %1 : vector<1x256xf32> to vector<8x256xf32>
    %27 = arith.subf %25, %26 : vector<8x256xf32>
    %28 = vector.broadcast %9 : vector<8x1xf32> to vector<8x256xf32>
    %29 = vector.broadcast %2 : vector<1x256xf32> to vector<8x256xf32>
    %30 = arith.subf %28, %29 : vector<8x256xf32>
    %31 = arith.minimumf %21, %24 : vector<8x256xf32>
    %32 = arith.minimumf %27, %30 : vector<8x256xf32>
    %33 = arith.minimumf %31, %32 : vector<8x256xf32>
    %cst = arith.constant 0.000000e+00 : f32
    %34 = vector.broadcast %cst : f32 to vector<8x256xf32>
    %35 = arith.cmpf ogt, %33, %34 : vector<8x256xf32>
    %36 = vector.broadcast %12 : vector<8x1xi1> to vector<8x256xi1>
    %37 = arith.andi %35, %36 : vector<8x256xi1>
    %38 = arith.addf %6, %8 : vector<8x1xf32>
    %cst_4 = arith.constant 5.000000e-01 : f32
    %39 = vector.broadcast %cst_4 : f32 to vector<8x1xf32>
    %40 = arith.mulf %38, %39 : vector<8x1xf32>
    %41 = arith.addf %7, %9 : vector<8x1xf32>
    %cst_5 = arith.constant 5.000000e-01 : f32
    %42 = vector.broadcast %cst_5 : f32 to vector<8x1xf32>
    %43 = arith.mulf %41, %42 : vector<8x1xf32>
    %cst_6 = arith.constant 2.500000e+00 : f32
    %44 = vector.broadcast %cst_6 : f32 to vector<1x256xf32>
    %45 = arith.mulf %44, %3 : vector<1x256xf32>
    %46 = vector.broadcast %40 : vector<8x1xf32> to vector<8x256xf32>
    %47 = vector.broadcast %45 : vector<1x256xf32> to vector<8x256xf32>
    %48 = arith.subf %46, %47 : vector<8x256xf32>
    %49 = vector.broadcast %1 : vector<1x256xf32> to vector<8x256xf32>
    %50 = arith.subf %49, %48 : vector<8x256xf32>
    %cst_7 = arith.constant 2.500000e+00 : f32
    %51 = vector.broadcast %cst_7 : f32 to vector<1x256xf32>
    %52 = arith.mulf %51, %4 : vector<1x256xf32>
    %53 = vector.broadcast %43 : vector<8x1xf32> to vector<8x256xf32>
    %54 = vector.broadcast %52 : vector<1x256xf32> to vector<8x256xf32>
    %55 = arith.subf %53, %54 : vector<8x256xf32>
    %56 = vector.broadcast %2 : vector<1x256xf32> to vector<8x256xf32>
    %57 = arith.subf %56, %55 : vector<8x256xf32>
    %cst_8 = arith.constant 2.500000e+00 : f32
    %58 = vector.broadcast %cst_8 : f32 to vector<1x256xf32>
    %59 = arith.mulf %58, %3 : vector<1x256xf32>
    %60 = vector.broadcast %40 : vector<8x1xf32> to vector<8x256xf32>
    %61 = vector.broadcast %59 : vector<1x256xf32> to vector<8x256xf32>
    %62 = arith.addf %60, %61 : vector<8x256xf32>
    %63 = vector.broadcast %1 : vector<1x256xf32> to vector<8x256xf32>
    %64 = arith.subf %62, %63 : vector<8x256xf32>
    %cst_9 = arith.constant 2.500000e+00 : f32
    %65 = vector.broadcast %cst_9 : f32 to vector<1x256xf32>
    %66 = arith.mulf %65, %4 : vector<1x256xf32>
    %67 = vector.broadcast %43 : vector<8x1xf32> to vector<8x256xf32>
    %68 = vector.broadcast %66 : vector<1x256xf32> to vector<8x256xf32>
    %69 = arith.addf %67, %68 : vector<8x256xf32>
    %70 = vector.broadcast %2 : vector<1x256xf32> to vector<8x256xf32>
    %71 = arith.subf %69, %70 : vector<8x256xf32>
    %72 = arith.minimumf %50, %57 : vector<8x256xf32>
    %73 = arith.minimumf %64, %71 : vector<8x256xf32>
    %74 = arith.minimumf %72, %73 : vector<8x256xf32>
    %cst_10 = arith.constant 0.000000e+00 : f32
    %75 = vector.broadcast %cst_10 : f32 to vector<8x256xf32>
    %76 = arith.cmpf ogt, %74, %75 : vector<8x256xf32>
    %77 = vector.broadcast %12 : vector<8x1xi1> to vector<8x256xi1>
    %78 = arith.andi %76, %77 : vector<8x256xi1>
    %79 = arith.ori %37, %78 : vector<8x256xi1>
    %80 = arith.extui %79 : vector<8x256xi1> to vector<8x256xi32>
    %81 = arith.sitofp %80 : vector<8x256xi32> to vector<8x256xf32>
    %cst_11 = arith.constant dense<0xFF800000> : vector<256xf32>
    %82 = vector.multi_reduction <maximumf>, %81, %cst_11 [0] : vector<8x256xf32> to vector<256xf32>
    %83 = vector.shape_cast %82 : vector<256xf32> to vector<1x256xf32>
    %cst_12 = arith.constant 0.000000e+00 : f32
    %84 = vector.broadcast %cst_12 : f32 to vector<1x256xf32>
    %85 = arith.cmpf ogt, %83, %84 : vector<1x256xf32>
    %86 = arith.andi %37, %78 : vector<8x256xi1>
    %c0_13 = arith.constant 0 : index
    %c0_14 = arith.constant 0 : index
    %87 = vector.load %arg2[%c0_13, %c0_14] : memref<4x256xf32, #tpu.memory_space<vmem>>, vector<4x256xf32>
    %88 = vector.extract_strided_slice %87 {offsets = [0, 0], sizes = [1, 256], strides = [1, 1]} : vector<4x256xf32> to vector<1x256xf32>
    %89 = vector.extract_strided_slice %87 {offsets = [1, 0], sizes = [1, 256], strides = [1, 1]} : vector<4x256xf32> to vector<1x256xf32>
    %90 = vector.extract_strided_slice %87 {offsets = [2, 0], sizes = [1, 256], strides = [1, 1]} : vector<4x256xf32> to vector<1x256xf32>
    %91 = vector.extract_strided_slice %87 {offsets = [3, 0], sizes = [1, 256], strides = [1, 1]} : vector<4x256xf32> to vector<1x256xf32>
    %92 = arith.subf %90, %88 : vector<1x256xf32>
    %93 = arith.subf %91, %89 : vector<1x256xf32>
    %94 = arith.mulf %92, %93 : vector<1x256xf32>
    %95 = arith.subf %8, %6 : vector<8x1xf32>
    %96 = arith.subf %9, %7 : vector<8x1xf32>
    %97 = arith.mulf %95, %96 : vector<8x1xf32>
    %98 = vector.broadcast %90 : vector<1x256xf32> to vector<8x256xf32>
    %99 = vector.broadcast %8 : vector<8x1xf32> to vector<8x256xf32>
    %100 = arith.minimumf %98, %99 : vector<8x256xf32>
    %101 = vector.broadcast %88 : vector<1x256xf32> to vector<8x256xf32>
    %102 = vector.broadcast %6 : vector<8x1xf32> to vector<8x256xf32>
    %103 = arith.maximumf %101, %102 : vector<8x256xf32>
    %104 = arith.subf %100, %103 : vector<8x256xf32>
    %cst_15 = arith.constant 0.000000e+00 : f32
    %105 = vector.broadcast %cst_15 : f32 to vector<8x256xf32>
    %106 = arith.maximumf %104, %105 : vector<8x256xf32>
    %107 = vector.broadcast %91 : vector<1x256xf32> to vector<8x256xf32>
    %108 = vector.broadcast %9 : vector<8x1xf32> to vector<8x256xf32>
    %109 = arith.minimumf %107, %108 : vector<8x256xf32>
    %110 = vector.broadcast %89 : vector<1x256xf32> to vector<8x256xf32>
    %111 = vector.broadcast %7 : vector<8x1xf32> to vector<8x256xf32>
    %112 = arith.maximumf %110, %111 : vector<8x256xf32>
    %113 = arith.subf %109, %112 : vector<8x256xf32>
    %cst_16 = arith.constant 0.000000e+00 : f32
    %114 = vector.broadcast %cst_16 : f32 to vector<8x256xf32>
    %115 = arith.maximumf %113, %114 : vector<8x256xf32>
    %116 = arith.mulf %106, %115 : vector<8x256xf32>
    %117 = vector.broadcast %94 : vector<1x256xf32> to vector<8x256xf32>
    %118 = vector.broadcast %97 : vector<8x1xf32> to vector<8x256xf32>
    %119 = arith.addf %117, %118 : vector<8x256xf32>
    %120 = arith.subf %119, %116 : vector<8x256xf32>
    %cst_17 = arith.constant 1.000000e-07 : f32
    %121 = vector.broadcast %cst_17 : f32 to vector<8x256xf32>
    %122 = arith.maximumf %120, %121 : vector<8x256xf32>
    %123 = arith.divf %116, %122 : vector<8x256xf32>
    %c0_18 = arith.constant 0 : index
    %c0_19 = arith.constant 0 : index
    %124 = vector.load %arg3[%c0_18, %c0_19] : memref<16x256xf32, #tpu.memory_space<vmem>>, vector<16x256xf32>
    %125 = math.log %124 : vector<16x256xf32>
    %cst_20 = arith.constant -1.000000e+02 : f32
    %126 = vector.broadcast %cst_20 : f32 to vector<16x256xf32>
    %127 = arith.maximumf %125, %126 : vector<16x256xf32>
    %cst_21 = arith.constant 1.000000e+00 : f32
    %128 = vector.broadcast %cst_21 : f32 to vector<16x256xf32>
    %129 = arith.subf %128, %124 : vector<16x256xf32>
    %130 = math.log %129 : vector<16x256xf32>
    %cst_22 = arith.constant -1.000000e+02 : f32
    %131 = vector.broadcast %cst_22 : f32 to vector<16x256xf32>
    %132 = arith.maximumf %130, %131 : vector<16x256xf32>
    %cst_23 = arith.constant dense<0.000000e+00> : vector<256xf32>
    %133 = vector.multi_reduction <add>, %132, %cst_23 [0] : vector<16x256xf32> to vector<256xf32>
    %134 = vector.shape_cast %133 : vector<256xf32> to vector<1x256xf32>
    %c0_24 = arith.constant 0 : index
    %c0_25 = arith.constant 0 : index
    %135 = vector.load %arg5[%c0_24, %c0_25] : memref<8x16xf32, #tpu.memory_space<vmem>>, vector<8x16xf32>
    %136 = arith.subf %127, %132 : vector<16x256xf32>
    %cst_26 = arith.constant dense<0.000000e+00> : vector<8x256xf32>
    %137 = tpu.matmul %135, %136, %cst_26 {dimension_numbers = #tpu.dot_dimension_numbers<[1], [0], [0], [1], [0, 0, 1, 1], [], []>} : vector<8x16xf32>, vector<16x256xf32>, vector<8x256xf32> -> vector<8x256xf32>
    %138 = vector.broadcast %134 : vector<1x256xf32> to vector<8x256xf32>
    %139 = arith.addf %138, %137 : vector<8x256xf32>
    %cst_27 = arith.constant 0.000000e+00 : f32
    %140 = vector.broadcast %cst_27 : f32 to vector<8x256xf32>
    %141 = arith.subf %140, %139 : vector<8x256xf32>
    %cst_28 = arith.constant 1.000000e-07 : f32
    %142 = vector.broadcast %cst_28 : f32 to vector<8x256xf32>
    %143 = arith.addf %123, %142 : vector<8x256xf32>
    %144 = math.log %143 : vector<8x256xf32>
    %cst_29 = arith.constant 0.000000e+00 : f32
    %145 = vector.broadcast %cst_29 : f32 to vector<8x256xf32>
    %146 = arith.subf %145, %144 : vector<8x256xf32>
    %cst_30 = arith.constant 1.000000e+00 : f32
    %147 = vector.broadcast %cst_30 : f32 to vector<8x256xf32>
    %148 = arith.mulf %141, %147 : vector<8x256xf32>
    %cst_31 = arith.constant 3.000000e+00 : f32
    %149 = vector.broadcast %cst_31 : f32 to vector<8x256xf32>
    %150 = arith.mulf %146, %149 : vector<8x256xf32>
    %151 = arith.addf %148, %150 : vector<8x256xf32>
    %152 = arith.extui %86 : vector<8x256xi1> to vector<8x256xi32>
    %153 = arith.sitofp %152 : vector<8x256xi32> to vector<8x256xf32>
    %cst_32 = arith.constant 1.000000e+00 : f32
    %154 = vector.broadcast %cst_32 : f32 to vector<8x256xf32>
    %155 = arith.subf %154, %153 : vector<8x256xf32>
    %cst_33 = arith.constant 1.000000e+05 : f32
    %156 = vector.broadcast %cst_33 : f32 to vector<8x256xf32>
    %157 = arith.mulf %155, %156 : vector<8x256xf32>
    %158 = arith.addf %151, %157 : vector<8x256xf32>
    %159 = arith.andi %85, %18 : vector<1x256xi1>
    %160 = vector.broadcast %159 : vector<1x256xi1> to vector<8x256xi1>
    %161 = vector.broadcast %12 : vector<8x1xi1> to vector<8x256xi1>
    %162 = arith.andi %160, %161 : vector<8x256xi1>
    %cst_34 = arith.constant 9.99999986E+14 : f32
    %163 = vector.broadcast %cst_34 : f32 to vector<8x256xf32>
    %164 = arith.select %162, %158, %163 : vector<8x256xi1>, vector<8x256xf32>
    %c0_35 = arith.constant 0 : index
    %c0_36 = arith.constant 0 : index
    %165 = vector.load %arg6[%c0_35, %c0_36] : memref<8x256xf32, #tpu.memory_space<vmem>>, vector<8x256xf32>
    tpu.vector_store %arg6[%c0_35, %c0_36], %164 {strides = array<i32>} : memref<8x256xf32, #tpu.memory_space<vmem>>, vector<8x256xf32>,
    %cst_37 = arith.constant 0.000000e+00 : f32
    %166 = vector.broadcast %cst_37 : f32 to vector<8x256xf32>
    %167 = arith.select %162, %123, %166 : vector<8x256xi1>, vector<8x256xf32>
    %c0_38 = arith.constant 0 : index
    %c0_39 = arith.constant 0 : index
    %168 = vector.load %arg7[%c0_38, %c0_39] : memref<8x256xf32, #tpu.memory_space<vmem>>, vector<8x256xf32>
    tpu.vector_store %arg7[%c0_38, %c0_39], %167 {strides = array<i32>} : memref<8x256xf32, #tpu.memory_space<vmem>>, vector<8x256xf32>,
    return
  }
  func.func @transform_0(%arg0: i32) -> (i32, i32) {
    %c0_i32 = arith.constant 0 : i32
    %c0_i32_0 = arith.constant 0 : i32
    return %c0_i32, %arg0 : i32, i32
  }
  func.func @transform_1(%arg0: i32) -> (i32, i32) {
    %c0_i32 = arith.constant 0 : i32
    %c0_i32_0 = arith.constant 0 : i32
    return %c0_i32, %arg0 : i32, i32
  }
  func.func @transform_2(%arg0: i32) -> (i32, i32) {
    %c0_i32 = arith.constant 0 : i32
    %c0_i32_0 = arith.constant 0 : i32
    return %c0_i32, %arg0 : i32, i32
  }
  func.func @transform_3(%arg0: i32) -> (i32, i32) {
    %c0_i32 = arith.constant 0 : i32
    %c0_i32_0 = arith.constant 0 : i32
    %c0_i32_1 = arith.constant 0 : i32
    return %c0_i32, %c0_i32_0 : i32, i32
  }
  func.func @transform_4(%arg0: i32) -> (i32, i32) {
    %c0_i32 = arith.constant 0 : i32
    %c0_i32_0 = arith.constant 0 : i32
    %c0_i32_1 = arith.constant 0 : i32
    return %c0_i32, %c0_i32_0 : i32, i32
  }
  func.func @transform_5(%arg0: i32) -> (i32, i32) {
    %c0_i32 = arith.constant 0 : i32
    %c0_i32_0 = arith.constant 0 : i32
    return %c0_i32, %arg0 : i32, i32
  }
  func.func @transform_6(%arg0: i32) -> (i32, i32) {
    %c0_i32 = arith.constant 0 : i32
    %c0_i32_0 = arith.constant 0 : i32
    return %c0_i32, %arg0 : i32, i32
  }
}

</mosaic_0001>

<bundles_post_ra>
// kernel: tpu_custom_call.1
= control target key start
LH: loop header
LB: loop body
LE: loop exit
PB: predicated region body
PF: predicated region fallthrough
CT: control target
= control target key end

     0   :  { %12 = vsyncpa [#allocation3], 0  ;;  %s978_s0 = inlined_call_operand.vmem [shape: f32[4,256], index: 0, kind: input, shape index: {}]   ;;  %s979_s1 = inlined_call_operand.hbm [shape: f32[4,256], index: 1, kind: input, shape index: {}]   ;;  %s980_s2 = inlined_call_operand.hbm [shape: f32[16,256], index: 2, kind: input, shape index: {}]   ;;  %s981_s3 = inlined_call_operand.vmem [shape: f32[8,4], index: 3, kind: input, shape index: {}]   ;;  %s982_s4 = inlined_call_operand.vmem [shape: f32[8,16], index: 4, kind: input, shape index: {}]   ;;  %s983_s5 = inlined_call_operand.hbm [shape: f32[8,256], index: 5, kind: output, shape index: {0}]   ;;  %s984_s6 = inlined_call_operand.hbm [shape: f32[8,256], index: 6, kind: output, shape index: {1}]  }
   0x1   :  { %13 = vsyncpa [#allocation6], 0 }
   0x2   :  { %14 = vsyncpa [#allocation4], 0 }
   0x3   :  { %15 = vsyncpa [#allocation9], 0  ;;  %s730_s21 = smov [#allocation2]   ;;  %s731_s23 = smov [#allocation5]  }
   0x4   :  { %s24_s22 = sshll.u32 %s730_s21, 4  ;;  %s33_s24 = sshll.u32 %s731_s23, 4  ;;  %s25_s22 = int_to_ptr.vmem [resolvable:$true] %s24_s22  ;;  %s779_s24 = int_to_ptr.vmem [resolvable:$true] %s33_s24 }
   0x5   :  { %s634_s27 = scalar_lea.hbm %s979_s1, 128 }
   0x6   :  { %p635_p0 = scmp.ne.s32.totalorder %s979_s1, %s634_s27  ;;  %p638_p1 = scmp.lt.u32.totalorder %s634_s27, %s979_s1 }
   0x8   :  { %p640_p2 = pnand %p638_p1, %p635_p0 }
   0xa   :  { %643 = shalt.err (!%p640_p2)
}
   0xb   :  { %s644_s8 = scalar_lea.vmem %s25_s22, 128  ;;  %p649_p4 = scmp.lt.s32.totalorder %s25_s22, %s25_s22 }
   0xc   :  { %p645_p3 = scmp.ne.s32.totalorder %s25_s22, %s644_s8  ;;  %p650_p5 = scmp.lt.s32.totalorder %s644_s8, %s644_s8 }
   0xe   :  { %p651_p6 = por %p650_p5, %p649_p4 }
  0x10   :  { %p652_p7 = pnand %p651_p6, %p645_p3 }
  0x12   :  { %655 = shalt.err (!%p652_p7)
}
  0x13   :  { %27 = dma.hbm_to_vmem [thread:$0]  %s979_s1, 128, %s25_s22, [#allocation3]  }
  0x14   :  { %s656_s13 = scalar_lea.hbm %s980_s2, 512 }
  0x15   :  { %p657_p8 = scmp.ne.s32.totalorder %s980_s2, %s656_s13  ;;  %p660_p9 = scmp.lt.u32.totalorder %s656_s13, %s980_s2 }
  0x17   :  { %p662_p10 = pnand %p660_p9, %p657_p8 }
  0x19   :  { %665 = shalt.err (!%p662_p10)
}
  0x1a   :  { %s666_s18 = scalar_lea.vmem %s779_s24, 512  ;;  %p671_p12 = scmp.lt.s32.totalorder %s779_s24, %s779_s24 }
  0x1b   :  { %p667_p11 = scmp.ne.s32.totalorder %s779_s24, %s666_s18  ;;  %p672_p13 = scmp.lt.s32.totalorder %s666_s18, %s666_s18 }
  0x1d   :  { %p673_p0 = por %p672_p13, %p671_p12 }
  0x1f   :  { %p674_p1 = pnand %p673_p0, %p667_p11 }
  0x21   :  { %677 = shalt.err (!%p674_p1)
}
  0x22   :  { %s732_s1 = smov 256   ;;  %s733_s19 = smov 16  }
  0x23   :  { %39 = dma.hbm_to_vmem [thread:$0]  %s980_s2, 512, %s779_s24, [#allocation6], %s732_s1, %s732_s1, %s733_s19  }
  0x24   :  { %722 = dma.done.wait [#allocation3], 128  }
  0x25   :  { %723 = vsyncadd [#allocation3], 4294967168 }
  0x26   :  { %724 = dma.done.wait [#allocation6], 512  }
  0x27   :  { %725 = vsyncadd [#allocation6], 4294966784  ;;  %v734_v0 = vmov 0.0   ;;  %v735_v1 = vmov 0   ;;  %v736_v2 = vmov 1   ;;  %v815_v3 = vld [vmem:[%s981_s3] sm:$0xff] }
  0x28   :  { %500 = vmatprep.mubr.f32.mxu0 %v734_v0  ;;  %603 = vset.pattern.permute.xlu1 %v735_v1  ;;  %v382_v4 = vld [vmem:[#allocation5 + $0x8] sm:$0xff]  ;;  %v384_v5 = vld [vmem:[#allocation5 + $0x18] sm:$0xff]  ;;  %s737_s2 = smov 2   ;;  %s738_s24 = smov 126   ;;  %v381_v8 = vld [vmem:[#allocation5] sm:$0xff]  ;;  %v739_v12 = vmov 2  }
  0x29   :  { %604 = vset.pattern.permute.xlu0 %v736_v2  ;;  %138 = vrot.lane.b32.xlu1 %v815_v3, %s738_s24  ;;  %610 = vlog2.f32 %v382_v4  ;;  %v398_v6 = vsub.f32 1.0, %v382_v4  ;;  %v400_v7 = vsub.f32 1.0, %v384_v5  ;;  %v383_v9 = vld [vmem:[#allocation5 + $0x10] sm:$0xff]  ;;  %v397_v10 = vsub.f32 1.0, %v381_v8  ;;  %v427_v46 = vld [vmem:[%s982_s4] sm:$0xff]  ;;  %s741_s26 = smov 127  }
  0x2a   :  { %248 = vrot.lane.b32.xlu0 %v815_v3, %s737_s2  ;;  %612 = vlog2.f32 %v384_v5  ;;  %v399_v11 = vsub.f32 1.0, %v383_v9  ;;  %v740_v21 = vmov 3   ;;  %vm432_vm0 = vcmask 130048  }
  0x2b   :  { %614 = vlog2.f32 %v398_v6 }
  0x2c   :  { %616 = vlog2.f32 %v400_v7 }
  0x2d   :  { %618 = vlog2.f32 %v381_v8  ;;  %85 = vperm.xlu1 %603, %v815_v3   ;;  %v65_v8 = vlaneseq }
  0x2e   :  { %620 = vlog2.f32 %v383_v9 }
  0x2f   :  { %622 = vlog2.f32 %v397_v10  ;;  %v837_v10 = vshrl.u32 %v65_v8, 7 }
  0x30   :  { %624 = vlog2.f32 %v399_v11  ;;  %v50_v11 = vld [vmem:[%s978_s0] sm:$0xff]  ;;  %s742_s0 = smov [#allocation8]  }
  0x31   :  { %605 = vset.pattern.permute.xlu1 %v739_v12  ;;  %s565_s28 = sshll.u32 %s742_s0, 4  ;;  %s566_s28 = int_to_ptr.vmem [resolvable:$true] %s565_s28 }
  0x32   :  { %115 = vperm.xlu1 %605, %v815_v3   ;;  %s678_s29 = scalar_lea.vmem %s566_s28, 256  ;;  %p683_p3 = scmp.lt.s32.totalorder %s566_s28, %s566_s28 }
  0x33   :  { %v611_v13 = vpop.eup %610  ;;  %p679_p2 = scmp.ne.s32.totalorder %s566_s28, %s678_s29  ;;  %p684_p4 = scmp.lt.s32.totalorder %s678_s29, %s678_s29 }
  0x34   :  { %v613_v14 = vpop.eup %612  ;;  %v388_v15 = vmul.f32 0.6931472, %v611_v13  ;;  %v845_v13 = vsub.s32 2, %v837_v10 }
  0x35   :  { %v615_v16 = vpop.eup %614  ;;  %v392_v17 = vmul.f32 0.6931472, %v613_v14  ;;  %v848_v14 = vsub.s32 6, %v837_v10  ;;  %p685_p5 = por %p684_p4, %p683_p3 }
  0x36   :  { %v617_v18 = vpop.eup %616  ;;  %v394_v19 = vmax.f32 %v388_v15, -100.0  ;;  %v404_v20 = vmul.f32 0.6931472, %v615_v16  ;;  %606 = vset.pattern.permute.xlu1 %v740_v21  ;;  %v143_v15 = vmul.f32 2.5, %v50_v11  ;;  %v851_v16 = vsub.s32 3, %v837_v10 }
  0x37   :  { %v619_v22 = vpop.eup %618  ;;  %v396_v23 = vmax.f32 %v392_v17, -100.0  ;;  %v408_v24 = vmul.f32 0.6931472, %v617_v18  ;;  %121 = vperm.xlu1 %606, %v815_v3   ;;  %v182_v17 = vsub.s32 7, %v837_v10  ;;  %v855_v18 = vsub.s32 0, %v837_v10  ;;  %p686_p6 = pnand %p685_p5, %p679_p2 }
  0x38   :  { %v621_v25 = vpop.eup %620  ;;  %v410_v26 = vmax.f32 %v404_v20, -100.0  ;;  %v386_v27 = vmul.f32 0.6931472, %v619_v22  ;;  %v859_v20 = vsub.s32 1, %v837_v10  ;;  %v96_v21 = vsub.s32 5, %v837_v10 }
  0x39   :  { %v623_v28 = vpop.eup %622  ;;  %v412_v29 = vmax.f32 %v408_v24, -100.0  ;;  %v390_v30 = vmul.f32 0.6931472, %v621_v25  ;;  %v157_v24 = vrot.slane %v143_v15, %v848_v14  ;;  %v179_v25 = vrot.slane %v143_v15, %v851_v16 }
  0x3a   :  { %v625_v31 = vpop.eup %624  ;;  %v429_v32 = vsub.f32 %v394_v19, %v410_v26  ;;  %v393_v33 = vmax.f32 %v386_v27, -100.0  ;;  %v402_v34 = vmul.f32 0.6931472, %v623_v28  ;;  %v71_v19 = vsub.s32 4, %v837_v10 }
  0x3b   :  { %v420_v35 = vadd.f32 %v412_v29, %v410_v26  ;;  %v431_v36 = vsub.f32 %v396_v23, %v412_v29  ;;  %v395_v37 = vmax.f32 %v390_v30, -100.0  ;;  %v406_v38 = vmul.f32 0.6931472, %v625_v31  ;;  %608 = vset.pattern.permute.xlu1 %v735_v1 }
  0x3c   :  { %v409_v39 = vmax.f32 %v402_v34, -100.0  ;;  %v153_v23 = vrot.slane %v143_v15, %v845_v13  ;;  %v183_v26 = vrot.slane %v143_v15, %v182_v17  ;;  %v68_v27 = vrot.slane %v50_v11, %v855_v18 }
  0x3d   :  { %v585_v40 = vpack.c.bf16 %v431_v36, %v429_v32  ;;  %v411_v41 = vmax.f32 %v406_v38, -100.0  ;;  %v421_v54 = vrot.slane %v420_v35, 4  ;;  %v72_v28 = vrot.slane %v50_v11, %v71_v19 }
  0x3e   :  { %v428_v42 = vsub.f32 %v393_v33, %v409_v39  ;;  %v93_v29 = vrot.slane %v50_v11, %v859_v20  ;;  %v97_v30 = vrot.slane %v50_v11, %v96_v21  ;;  %v163_v31 = vrot.slane %v153_v23, %v845_v13 }
  0x3f   :  { %586 = vmatprep.subr.bf16.mxu0 %v585_v40  ;;  %v413_v43 = vadd.f32 %v411_v41, %v409_v39  ;;  %v430_v44 = vsub.f32 %v395_v37, %v411_v41  ;;  %v422_v57 = vadd.f32 %v421_v54, %v420_v35  ;;  %v167_v32 = vrot.slane %v157_v24, %v845_v13 }
  0x40   :  { %v189_v33 = vrot.slane %v179_v25, %v851_v16  ;;  %v193_v35 = vrot.slane %v183_v26, %v851_v16  ;;  %v78_v36 = vrot.slane %v68_v27, %v855_v18  ;;  %v82_v37 = vrot.slane %v72_v28, %v855_v18 }
  0x41   :  { %v587_v45 = vpack.c.bf16 %v430_v44, %v428_v42  ;;  %v414_v56 = vrot.slane %v413_v43, 4  ;;  %v423_v59 = vrot.slane %v422_v57, 2  ;;  %v103_v38 = vrot.slane %v93_v29, %v859_v20 }
  0x42   :  { %v107_v39 = vrot.slane %v97_v30, %v859_v20 }
  0x43   :  { %588 = vmatpush1.bf16.msra.mxu0 %v587_v45  ;;  %v415_v58 = vadd.f32 %v414_v56, %v413_v43  ;;  %v424_v61 = vadd.f32 %v423_v59, %v422_v57  ;;  %v238_v57 = vld [vmem:[#allocation2] sm:$0xff] }
  0x44   :  { %v284_v27 = vrot.slane %v238_v57, %v71_v19  ;;  %v260_v28 = vrot.slane %v238_v57, %v845_v13  ;;  %v264_v29 = vrot.slane %v238_v57, %v848_v14 }
  0x45   :  { %v416_v60 = vrot.slane %v415_v58, 2  ;;  %v425_v63 = vrot.slane %v424_v61, 1 }
  0x46   :  { %582 = vmatmul.mubr.msk.f32.vlgmr.msra.gmra.mrb[0].mxu0 %vm432_vm0, %v427_v46 }
  0x47   :  { %v417_v62 = vadd.f32 %v416_v60, %v415_v58  ;;  %v426_v4 = vadd.f32 %v425_v63, %v424_v61 }
  0x49   :  { %v418_v1 = vrot.slane %v417_v62, 1 }
  0x9b   :  { %v139_v48 = vpop.permute.xlu1 %138 }
  0x9c   :  { %v249_v47 = vpop.permute.xlu0 %248  ;;  %v141_v50 = vadd.f32 %v139_v48, %v815_v3 }
  0x9d   :  { %v251_v49 = vsub.f32 %v815_v3, %v249_v47 }
  0x9e   :  { %v142_v51 = vmul.f32 0.5, %v141_v50 }
  0x9f   :  { %253 = vrot.lane.b32.xlu0 %v251_v49, %s741_s26 }
  0xa0   :  { %146 = vperm.xlu1 %608, %v142_v51  }
  0xa3   :  { %109 = vperm.xlu0 %604, %v815_v3   ;;  %v419_v3 = vadd.f32 %v418_v1, %v417_v62 }
  0xa4   :  { %609 = vset.pattern.permute.xlu1 %v736_v2 }
  0xa5   :  { %173 = vperm.xlu1 %609, %v142_v51  }
  0xa7   :  { %607 = vset.pattern.permute.xlu0 %v739_v12 }
  0xac   :  { %v833_v7 = vpop.permute.xlu1 %85 }
  0xad   :  { %v89_v50 = vsub.f32 %v82_v37, %v833_v7 }
  0xb1   :  { %v835_v9 = vpop.permute.xlu1 %115 }
  0xb2   :  { %v118_v51 = vsub.f32 %v835_v9, %v78_v36 }
  0xb6   :  { %v842_v12 = vpop.permute.xlu1 %121 }
  0xb7   :  { %v125_v54 = vsub.f32 %v842_v12, %v107_v39 }
 0x111   :  { %v254_v52 = vpop.permute.xlu0 %253 }
 0x112   :  { %v256_v53 = vmul.f32 %v254_v52, %v251_v49  ;;  %v88_v49 = vsub.f32 %v78_v36, %v833_v7  ;;  %v119_v52 = vsub.f32 %v835_v9, %v82_v37 }
 0x114   :  { %368 = vperm.xlu0 %607, %v256_v53   ;;  %v124_v53 = vsub.f32 %v842_v12, %v103_v38  ;;  %v129_v23 = vmin.f32 %v119_v52, %v125_v54 }
 0x116   :  { %v128_v8 = vmin.f32 %v118_v51, %v124_v53 }
 0x119   :  { %v502_v55 = vpop.f32.mrb[0].mxu0 }
 0x11a   :  { %v504_v5 = vpop.f32.mrb[1].mxu0  ;;  %v831_v6 = vadd.f32 %v502_v55, %v419_v3  ;;  %v240_v3 = vrot.slane %v238_v57, 6 }
 0x11b   :  { %v829_v2 = vadd.f32 %v504_v5, %v426_v4  ;;  %v280_v5 = vrot.slane %v238_v57, %v855_v18 }
 0x11c   :  { %v242_v30 = vsub.f32 %v238_v57, %v240_v3 }
 0x11f   :  { %v147_v22 = vpop.permute.xlu1 %146 }
 0x120   :  { %v168_v40 = vsub.f32 %v147_v22, %v163_v31  ;;  %v169_v41 = vsub.f32 %v147_v22, %v167_v32  ;;  %v198_v42 = vadd.f32 %v163_v31, %v147_v22  ;;  %v199_v45 = vadd.f32 %v167_v32, %v147_v22 }
 0x121   :  { %v304_v31 = vrot.slane %v238_v57, %v851_v16  ;;  %v308_v32 = vrot.slane %v238_v57, %v182_v17 }
 0x122   :  { %v877_v48 = vpop.permute.xlu0 %109  ;;  %v170_v55 = vsub.f32 %v78_v36, %v168_v40  ;;  %v171_v56 = vsub.f32 %v82_v37, %v169_v41  ;;  %v200_v58 = vsub.f32 %v198_v42, %v78_v36  ;;  %v201_v62 = vsub.f32 %v199_v45, %v82_v37 }
 0x123   :  { %v112_v61 = vsub.f32 %v103_v38, %v877_v48  ;;  %v113_v4 = vsub.f32 %v107_v39, %v877_v48  ;;  %v290_v37 = vrot.slane %v280_v5, %v855_v18  ;;  %v270_v40 = vrot.slane %v260_v28, %v845_v13 }
 0x124   :  { %v174_v34 = vpop.permute.xlu1 %173  ;;  %v274_v41 = vrot.slane %v264_v29, %v845_v13  ;;  %v581_v42 = vrot.slane %v242_v30, 9  ;;  %v314_v10 = vrot.slane %v304_v31, %v851_v16  ;;  %v318_v17 = vrot.slane %v308_v32, %v851_v16 }
 0x125   :  { %v194_v43 = vsub.f32 %v174_v34, %v189_v33  ;;  %v202_v44 = vadd.f32 %v189_v33, %v174_v34  ;;  %v195_v46 = vsub.f32 %v174_v34, %v193_v35  ;;  %v203_v47 = vadd.f32 %v193_v35, %v174_v34 }
 0x126   :  { %v126_v22 = vmin.f32 %v88_v49, %v112_v61  ;;  %v127_v26 = vmin.f32 %v89_v50, %v113_v4  ;;  %v324_v33 = vrot.slane %v238_v57, %v859_v20  ;;  %v328_v34 = vrot.slane %v238_v57, %v96_v21 }
 0x127   :  { %v196_v59 = vsub.f32 %v103_v38, %v194_v43  ;;  %v204_v60 = vsub.f32 %v202_v44, %v103_v38  ;;  %v197_v63 = vsub.f32 %v107_v39, %v195_v46  ;;  %v205_v1 = vsub.f32 %v203_v47, %v107_v39 }
 0x128   :  { %v130_v36 = vmin.f32 %v126_v22, %v128_v8  ;;  %v131_v19 = vmin.f32 %v127_v26, %v129_v23  ;;  %v294_v39 = vrot.slane %v284_v27, %v855_v18  ;;  %v334_v21 = vrot.slane %v324_v33, %v859_v20 }
 0x129   :  { %v206_v11 = vmin.f32 %v170_v55, %v196_v59  ;;  %v208_v15 = vmin.f32 %v200_v58, %v204_v60  ;;  %v207_v24 = vmin.f32 %v171_v56, %v197_v63  ;;  %v209_v25 = vmin.f32 %v201_v62, %v205_v1 }
 0x12a   :  { %v338_v43 = vrot.slane %v328_v34, %v859_v20  ;;  %vm906_vm1 = vcmp.gt.f32.partialorder %v130_v36, 0.0  ;;  %v295_v18 = vmax.f32 %v290_v37, %v833_v7  ;;  %vm912_vm3 = vcmp.gt.f32.partialorder %v131_v19, 0.0 }
 0x12b   :  { %v894_v35 = vmin.f32 %v206_v11, %v208_v15  ;;  %v897_v38 = vmin.f32 %v207_v24, %v209_v25  ;;  %v296_v16 = vmax.f32 %v294_v39, %v833_v7  ;;  %v275_v46 = vmin.f32 %v270_v40, %v835_v9 }
 0x12c   :  { %v276_v20 = vmin.f32 %v274_v41, %v835_v9  ;;  %v247_v47 = vmul.f32 %v581_v42, %v242_v30  ;;  %v319_v49 = vmin.f32 %v314_v10, %v842_v12  ;;  %v320_v50 = vmin.f32 %v318_v17, %v842_v12 }
 0x12d   :  { %vm212_vm2 = vcmp.gt.f32.partialorder %v894_v35, 0.0  ;;  %vm213_vm4 = vcmp.gt.f32.partialorder %v897_v38, 0.0  ;;  %v339_v51 = vmax.f32 %v334_v21, %v877_v48  ;;  %v340_v52 = vmax.f32 %v338_v43, %v877_v48 }
 0x12e   :  { %vm216_vm5 = vmor %vm906_vm1, %vm212_vm2  ;;  %v297_v7 = vsub.f32 %v275_v46, %v295_v18  ;;  %v298_v9 = vsub.f32 %v276_v20, %v296_v16  ;;  %v351_v53 = vrot.slane %v247_v47, %v845_v13  ;;  %v355_v48 = vrot.slane %v247_v47, %v848_v14 }
 0x12f   :  { %vm217_vm6 = vmor %vm912_vm3, %vm213_vm4  ;;  %v579_v12 = vsel %vm216_vm5, 1.0, %v734_v0  ;;  %v341_v54 = vsub.f32 %v319_v49, %v339_v51  ;;  %v342_v55 = vsub.f32 %v320_v50, %v340_v52 }
 0x130   :  { %v580_v56 = vsel %vm217_vm6, 1.0, %v734_v0  ;;  %v222_v57 = vrot.slane %v579_v12, 4  ;;  %v299_v58 = vmax.f32 %v297_v7, 0.0  ;;  %v300_v59 = vmax.f32 %v298_v9, 0.0 }
 0x131   :  { %v228_v60 = vrot.slane %v580_v56, 4  ;;  %v343_v61 = vmax.f32 %v341_v54, 0.0  ;;  %v344_v62 = vmax.f32 %v342_v55, 0.0  ;;  %v361_v63 = vrot.slane %v351_v53, %v845_v13 }
 0x132   :  { %v365_v1 = vrot.slane %v355_v48, %v845_v13  ;;  %v223_v4 = vmax.f32 %v579_v12, %v222_v57 }
 0x133   :  { %v229_v5 = vmax.f32 %v580_v56, %v228_v60  ;;  %v345_v8 = vmul.f32 %v343_v61, %v299_v58  ;;  %v346_v11 = vmul.f32 %v344_v62, %v300_v59 }
 0x134   :  { %v224_v24 = vrot.slane %v223_v4, 2 }
 0x135   :  { %v230_v25 = vrot.slane %v229_v5, 2 }
 0x136   :  { %v225_v28 = vmax.f32 %v223_v4, %v224_v24 }
 0x137   :  { %v231_v29 = vmax.f32 %v229_v5, %v230_v25 }
 0x138   :  { %v226_v30 = vrot.slane %v225_v28, 1 }
 0x139   :  { %v232_v31 = vrot.slane %v231_v29, 1 }
 0x13a   :  { %v227_v13 = vmax.f32 %v225_v28, %v226_v30 }
 0x13b   :  { %v233_v32 = vmax.f32 %v231_v29, %v232_v31 }
 0x13c   :  { %vm234_vm7 = vcmp.gt.f32.partialorder %v227_v13, 0.0 }
 0x13d   :  { %vm235_vm8 = vcmp.gt.f32.partialorder %v233_v32, 0.0 }
 0x193   :  { %v369_v3 = vpop.permute.xlu0 %368 }
 0x194   :  { %v371_v15 = vadd.f32 %v369_v3, %v361_v63  ;;  %v372_v22 = vadd.f32 %v369_v3, %v365_v1 }
 0x196   :  { %v373_v14 = vsub.f32 %v371_v15, %v345_v8  ;;  %v374_v23 = vsub.f32 %v372_v22, %v346_v11 }
 0x198   :  { %v375_v26 = vmax.f32 %v373_v14, 1e-07  ;;  %v376_v27 = vmax.f32 %v374_v23, 1e-07 }
 0x19a   :  { %626 = vrcp.f32 %v375_v26 }
 0x19b   :  { %628 = vrcp.f32 %v376_v27 }
 0x1a4   :  { %v627_v33 = vpop.eup %626 }
 0x1a5   :  { %v629_v34 = vpop.eup %628  ;;  %v378_v36 = vmul.f32 %v627_v33, %v345_v8 }
 0x1a6   :  { %v380_v37 = vmul.f32 %v629_v34, %v346_v11 }
 0x1a7   :  { %v511_v19 = vadd.f32 1e-07, %v378_v36  ;;  %v545_v39 = vsel %vm234_vm7, %v378_v36, 0.0 }
 0x1a8   :  { %v512_v40 = vadd.f32 1e-07, %v380_v37  ;;  %v546_v41 = vsel %vm235_vm8, %v380_v37, 0.0  ;;  %547 = vst [vmem:[#allocation8] sm:$0xff] %v545_v39 }
 0x1a9   :  { %630 = vlog2.f32 %v511_v19  ;;  %548 = vst [vmem:[#allocation8 + $0x8] sm:$0xff] %v546_v41 }
 0x1aa   :  { %632 = vlog2.f32 %v512_v40 }
 0x1ab   :  { %689 = shalt.err (!%p686_p6)
}
 0x1ac   :  { %s690_s8 = scalar_lea.hbm %s984_s6, 256 }
 0x1ad   :  { %p691_p7 = scmp.ne.s32.totalorder %s984_s6, %s690_s8  ;;  %p694_p8 = scmp.lt.u32.totalorder %s690_s8, %s984_s6 }
 0x1af   :  { %p696_p9 = pnand %p694_p8, %p691_p7 }
 0x1b1   :  { %699 = shalt.err (!%p696_p9)
}
 0x1b2   :  { %568 = dma.vmem_to_hbm [thread:$0]  %s566_s28, 256, %s984_s6, [#allocation9]   ;;  %vm236_vm9 = vmand %vm906_vm1, %vm212_vm2  ;;  %v509_v16 = vsub.f32 0.0, %v831_v6  ;;  %v510_v44 = vsub.f32 0.0, %v829_v2 }
 0x1b3   :  { %vm237_vm10 = vmand %vm912_vm3, %vm213_vm4  ;;  %v631_v42 = vpop.eup %630  ;;  %v583_v10 = vsel %vm236_vm9, 1.0, %v734_v0  ;;  %s743_s6 = smov [#allocation7]  }
 0x1b4   :  { %v633_v17 = vpop.eup %632  ;;  %v514_v21 = vmul.f32 0.6931472, %v631_v42  ;;  %v584_v43 = vsel %vm237_vm10, 1.0, %v734_v0  ;;  %v527_v35 = vsub.f32 1.0, %v583_v10  ;;  %s555_s15 = sshll.u32 %s743_s6, 4  ;;  %s556_s15 = int_to_ptr.vmem [resolvable:$true] %s555_s15 }
 0x1b5   :  { %v516_v18 = vmul.f32 0.6931472, %v633_v17  ;;  %v528_v47 = vsub.f32 1.0, %v584_v43  ;;  %s700_s16 = scalar_lea.vmem %s556_s15, 256  ;;  %p705_p11 = scmp.lt.s32.totalorder %s556_s15, %s556_s15 }
 0x1b6   :  { %v517_v46 = vsub.f32 0.0, %v514_v21  ;;  %v529_v50 = vmul.f32 100000.0, %v527_v35  ;;  %p701_p10 = scmp.ne.s32.totalorder %s556_s15, %s700_s16  ;;  %p706_p12 = scmp.lt.s32.totalorder %s700_s16, %s700_s16 }
 0x1b7   :  { %v518_v20 = vsub.f32 0.0, %v516_v18  ;;  %v530_v52 = vmul.f32 100000.0, %v528_v47 }
 0x1b8   :  { %v519_v38 = vmul.f32 3.0, %v517_v46  ;;  %p707_p13 = por %p706_p12, %p705_p11 }
 0x1b9   :  { %v520_v49 = vmul.f32 3.0, %v518_v20 }
 0x1ba   :  { %v521_v45 = vadd.f32 %v519_v38, %v509_v16  ;;  %p708_p0 = pnand %p707_p13, %p701_p10 }
 0x1bb   :  { %v522_v51 = vadd.f32 %v520_v49, %v510_v44 }
 0x1bc   :  { %v531_v7 = vadd.f32 %v529_v50, %v521_v45 }
 0x1bd   :  { %v532_v9 = vadd.f32 %v530_v52, %v522_v51 }
 0x1be   :  { %v541_v0 = vsel %vm234_vm7, %v531_v7, 1e+15 }
 0x1bf   :  { %v542_v6 = vsel %vm235_vm8, %v532_v9, 1e+15  ;;  %543 = vst [vmem:[#allocation7] sm:$0xff] %v541_v0 }
 0x1c0   :  { %544 = vst [vmem:[#allocation7 + $0x8] sm:$0xff] %v542_v6 }
 0x1c1   :  { %711 = shalt.err (!%p708_p0)
}
 0x1c2   :  { %s712_s1 = scalar_lea.hbm %s983_s5, 256 }
 0x1c3   :  { %p713_p1 = scmp.ne.s32.totalorder %s983_s5, %s712_s1  ;;  %p716_p2 = scmp.lt.u32.totalorder %s712_s1, %s983_s5 }
 0x1c5   :  { %p718_p3 = pnand %p716_p2, %p713_p1 }
 0x1c7   :  { %721 = shalt.err (!%p718_p3)
}
 0x1c8   :  { %558 = dma.vmem_to_hbm [thread:$0]  %s556_s15, 256, %s983_s5, [#allocation4]  }
 0x1c9   :  { %726 = dma.done.wait [#allocation4], 256  }
 0x1ca   :  { %727 = vsyncadd [#allocation4], 4294967040 }
 0x1cb   :  { %728 = dma.done.wait [#allocation9], 256  }
 0x1cc   :  { %729 = vsyncadd [#allocation9], 4294967040 }
 0x1cd   :  { %575 = vsyncpa [#allocation3], 1 }
 0x1ce   :  { %576 = vsyncpa [#allocation6], 1 }
 0x1cf   :  { %577 = vsyncpa [#allocation4], 1 }
 0x1d0   :  { %578 = vsyncpa [#allocation9], 1 }

</bundles_post_ra>
